<compile_context>
chip_gen: v7x
topology: tpu7x:2x2x1
jax: 0.10.0
libtpu: 0.0.40
codegen_flags: <defaults>
</compile_context>

<pallas_src>
import functools

import jax
import jax.numpy as jnp
from jax.experimental import pallas as pl
from jax.experimental.pallas import tpu as pltpu


def _round_up(x: int, m: int) -> int:
    return ((x + m - 1) // m) * m


def mlp_kernel(x_ref, w1_ref, b1_ref, w2_ref, b2_ref, o_ref):
    cd = w1_ref.dtype
    # HIGHEST precision only matters for the f32 MXU path (multi-pass); bf16 is
    # native, leave it at default there.
    prec = jax.lax.Precision.HIGHEST if cd == jnp.float32 else None

    # Cast the activations to the matmul dtype inside the kernel (no wrapper
    # pad/cast pass).  K = 107 lanes are handled by Mosaic masking.
    x = x_ref[...].astype(cd)

    # fc_1: (TM, 107) @ (107, 128) -> f32 accumulator on the MXU.
    h = jnp.dot(x, w1_ref[...], preferred_element_type=jnp.float32, precision=prec)
    # Bias + ReLU epilogue in f32 (v5e VPU has no bf16 path).
    h = jnp.maximum(h + b1_ref[...], 0.0)
    # Single deliberate cast of the hidden tile back to the matmul dtype.
    h = h.astype(cd)

    # fc_2: (TM, 128) @ (128, 8) -> f32, contiguous 32 B/row store.
    out = jnp.dot(h, w2_ref[...], preferred_element_type=jnp.float32, precision=prec)
    o_ref[...] = (out + b2_ref[...]).astype(o_ref.dtype)


@functools.partial(jax.jit, static_argnames=("block_rows", "use_bf16"))
def nn_1_forward(x, w1, b1, w2, b2, *, block_rows: int = 2048, use_bf16: bool = True):
    """out = relu(x @ w1 + b1) @ w2 + b2, weights stored as (in, out)."""
    B, F = x.shape          # (batch, 107)
    H = w1.shape[1]         # 107
    O = w2.shape[1]         # 2

    HP = _round_up(H, 128)  # 128  (hidden lanes)
    OP = _round_up(O, 8)    # 8    (narrow, lane-dense-enough output)

    # Batch tiling: large row tile; ensure >=2 grid steps when the batch is big
    # enough so the "parallel" axis actually shards across both v7x TCs.
    block_rows = _round_up(max(block_rows, 8), 8)
    TM = min(block_rows, _round_up(B, 8))
    if B >= 16:
        TM = min(TM, _round_up(pl.cdiv(B, 2), 8))
    grid_m = pl.cdiv(B, TM)  # partial last block is masked by Pallas

    compute_dtype = jnp.bfloat16 if use_bf16 else jnp.float32

    # Only the tiny weights/biases are padded & cast in the wrapper (negligible
    # traffic).  Padded W1 cols / W2 rows-cols / bias lanes are zero -> exact.
    w1_p = jnp.zeros((F, HP), compute_dtype).at[:, :H].set(w1.astype(compute_dtype))
    b1_p = jnp.zeros((1, HP), jnp.float32).at[:, :H].set(b1.astype(jnp.float32))
    w2_p = jnp.zeros((HP, OP), compute_dtype).at[:H, :O].set(w2.astype(compute_dtype))
    b2_p = jnp.zeros((1, OP), jnp.float32).at[:, :O].set(b2.astype(jnp.float32))

    w_itemsize = jnp.dtype(compute_dtype).itemsize
    flops = 2 * B * F * HP + 2 * B * HP * OP
    bytes_accessed = (
        B * F * x.dtype.itemsize       # x in (unpadded, un-copied)
        + F * HP * w_itemsize          # w1
        + HP * OP * w_itemsize         # w2
        + (HP + OP) * 4                # biases
        + B * OP * 4                   # output (8 lanes f32)
    )

    vmem = pltpu.MemorySpace.VMEM

    out_p = pl.pallas_call(
        mlp_kernel,
        out_shape=jax.ShapeDtypeStruct((B, OP), jnp.float32),
        grid=(grid_m,),
        in_specs=[
            # Activations stream over the batch grid, last dim = full extent.
            pl.BlockSpec((TM, F), lambda i: (i, 0), memory_space=vmem),
            # Tiny weights / biases stay resident in VMEM across the grid.
            pl.BlockSpec((F, HP), lambda i: (0, 0), memory_space=vmem),
            pl.BlockSpec((1, HP), lambda i: (0, 0), memory_space=vmem),
            pl.BlockSpec((HP, OP), lambda i: (0, 0), memory_space=vmem),
            pl.BlockSpec((1, OP), lambda i: (0, 0), memory_space=vmem),
        ],
        out_specs=pl.BlockSpec((TM, OP), lambda i: (i, 0), memory_space=vmem),
        compiler_params=pltpu.CompilerParams(
            dimension_semantics=("parallel",),  # megacore sharding on v7x
        ),
        cost_estimate=pl.CostEstimate(
            flops=int(flops), transcendentals=0, bytes_accessed=int(bytes_accessed)
        ),
    )(x, w1_p, b1_p, w2_p, b2_p)

    # Slice the padded output lanes (and any masked partial-block rows are
    # already confined to [:B]).
    return out_p[:, :O]


def init_params(key, in_features=107, hidden=107, out_features=2):
    # Mirror PyTorch nn.Linear default init: U(-1/sqrt(fan_in), 1/sqrt(fan_in)).
    k1, k2, k3, k4 = jax.random.split(key, 4)
    bound1 = 1.0 / jnp.sqrt(jnp.float32(in_features))
    bound2 = 1.0 / jnp.sqrt(jnp.float32(hidden))
    # Stored as (in, out) — i.e. transpose of PyTorch's (out, in) weight.
    w1 = jax.random.uniform(k1, (in_features, hidden), jnp.float32,
                            minval=-bound1, maxval=bound1)
    b1 = jax.random.uniform(k2, (1, hidden), jnp.float32,
                            minval=-bound1, maxval=bound1)
    w2 = jax.random.uniform(k3, (hidden, out_features), jnp.float32,
                            minval=-bound2, maxval=bound2)
    b2 = jax.random.uniform(k4, (1, out_features), jnp.float32,
                            minval=-bound2, maxval=bound2)
    return w1, b1, w2, b2


if __name__ == "__main__":
    key = jax.random.PRNGKey(0)
    kx, kp, kx2 = jax.random.split(key, 3)
    w1, b1, w2, b2 = init_params(kp)

    def ref_fn(x):
        return jnp.maximum(x @ w1 + b1, 0.0) @ w2 + b2

    # Small batch (single grid step).
    batch = 8
    x = jax.random.normal(kx, (batch, 107), jnp.float32)
    ref = ref_fn(x)

    # f32 path (Precision.HIGHEST): exact up to f32 accumulation noise.
    out_f32 = jax.block_until_ready(
        nn_1_forward(x, w1, b1, w2, b2, use_bf16=False))
    assert out_f32.shape == (batch, 2)
    assert jnp.allclose(out_f32, ref, atol=1e-5, rtol=1e-5)

    # bf16-MXU path (default): f32 accumulation, only bf16 input rounding.
    out_bf16 = jax.block_until_ready(
        nn_1_forward(x, w1, b1, w2, b2, use_bf16=True))
    assert out_bf16.shape == (batch, 2)
    assert jnp.allclose(out_bf16, ref, atol=3e-2, rtol=3e-2)

    # Ragged batch (exercises >=2 "parallel" grid steps + masked partial block).
    batch2 = 37
    x2 = jax.random.normal(kx2, (batch2, 107), jnp.float32)
    ref2 = ref_fn(x2)
    out2 = jax.block_until_ready(
        nn_1_forward(x2, w1, b1, w2, b2, use_bf16=True))
    assert out2.shape == (batch2, 2)
    assert jnp.allclose(out2, ref2, atol=3e-2, rtol=3e-2)

    print("KERNEL_OK")
</pallas_src>

<mosaic_0001>
module attributes {stable_mosaic.version = 11 : i64} {
  func.func @mlp_kernel(%arg0: i32, %arg1: memref<8x107xf32, #tpu.memory_space<vmem>>, %arg2: memref<107x128xf32, #tpu.memory_space<vmem>>, %arg3: memref<1x128xf32, #tpu.memory_space<vmem>>, %arg4: memref<128x8xf32, #tpu.memory_space<vmem>>, %arg5: memref<1x8xf32, #tpu.memory_space<vmem>>, %arg6: memref<8x8xf32, #tpu.memory_space<vmem>>) attributes {dimension_semantics = [#tpu.dimension_semantics<parallel>], iteration_bounds = array<i64: 1>, scalar_prefetch = 0 : i64, scratch_operands = 0 : i64, tpu.core_type = #tpu.core_type<tc>, window_params = [{transform_indices = @transform_0, window_bounds = array<i64: 8, 107>}, {pipeline_mode = #tpu.pipeline_mode<synchronous>, transform_indices = @transform_1, window_bounds = array<i64: 107, 128>}, {pipeline_mode = #tpu.pipeline_mode<synchronous>, transform_indices = @transform_2, window_bounds = array<i64: 1, 128>}, {pipeline_mode = #tpu.pipeline_mode<synchronous>, transform_indices = @transform_3, window_bounds = array<i64: 128, 8>}, {pipeline_mode = #tpu.pipeline_mode<synchronous>, transform_indices = @transform_4, window_bounds = array<i64: 1, 8>}, {transform_indices = @transform_5, window_bounds = array<i64: 8, 8>}]} {
    %c0 = arith.constant 0 : index
    %c0_0 = arith.constant 0 : index
    %0 = vector.load %arg1[%c0, %c0_0] : memref<8x107xf32, #tpu.memory_space<vmem>>, vector<8x107xf32>
    %c0_1 = arith.constant 0 : index
    %c0_2 = arith.constant 0 : index
    %1 = vector.load %arg2[%c0_1, %c0_2] : memref<107x128xf32, #tpu.memory_space<vmem>>, vector<107x128xf32>
    %cst = arith.constant dense<0.000000e+00> : vector<8x128xf32>
    %2 = tpu.matmul %0, %1, %cst {dimension_numbers = #tpu.dot_dimension_numbers<[1], [0], [0], [1], [0, 0, 1, 1], [], []>, precision = #tpu.contract_precision<fp32>} : vector<8x107xf32>, vector<107x128xf32>, vector<8x128xf32> -> vector<8x128xf32>
    %c0_3 = arith.constant 0 : index
    %c0_4 = arith.constant 0 : index
    %3 = vector.load %arg3[%c0_3, %c0_4] : memref<1x128xf32, #tpu.memory_space<vmem>>, vector<1x128xf32>
    %4 = vector.broadcast %3 : vector<1x128xf32> to vector<8x128xf32>
    %5 = arith.addf %2, %4 : vector<8x128xf32>
    %cst_5 = arith.constant 0.000000e+00 : f32
    %6 = vector.broadcast %cst_5 : f32 to vector<8x128xf32>
    %7 = arith.maximumf %5, %6 : vector<8x128xf32>
    %c0_6 = arith.constant 0 : index
    %c0_7 = arith.constant 0 : index
    %8 = vector.load %arg4[%c0_6, %c0_7] : memref<128x8xf32, #tpu.memory_space<vmem>>, vector<128x8xf32>
    %cst_8 = arith.constant dense<0.000000e+00> : vector<8x8xf32>
    %9 = tpu.matmul %7, %8, %cst_8 {dimension_numbers = #tpu.dot_dimension_numbers<[1], [0], [0], [1], [0, 0, 1, 1], [], []>, precision = #tpu.contract_precision<fp32>} : vector<8x128xf32>, vector<128x8xf32>, vector<8x8xf32> -> vector<8x8xf32>
    %c0_9 = arith.constant 0 : index
    %c0_10 = arith.constant 0 : index
    %10 = vector.load %arg5[%c0_9, %c0_10] : memref<1x8xf32, #tpu.memory_space<vmem>>, vector<1x8xf32>
    %11 = vector.broadcast %10 : vector<1x8xf32> to vector<8x8xf32>
    %12 = arith.addf %9, %11 : vector<8x8xf32>
    %c0_11 = arith.constant 0 : index
    %c0_12 = arith.constant 0 : index
    %13 = vector.load %arg6[%c0_11, %c0_12] : memref<8x8xf32, #tpu.memory_space<vmem>>, vector<8x8xf32>
    tpu.vector_store %arg6[%c0_11, %c0_12], %12 {strides = array<i32>} : memref<8x8xf32, #tpu.memory_space<vmem>>, vector<8x8xf32>,
    return
  }
  func.func @transform_0(%arg0: i32) -> (i32, i32) {
    %c0_i32 = arith.constant 0 : i32
    %c0_i32_0 = arith.constant 0 : i32
    return %arg0, %c0_i32 : i32, i32
  }
  func.func @transform_1(%arg0: i32) -> (i32, i32) {
    %c0_i32 = arith.constant 0 : i32
    %c0_i32_0 = arith.constant 0 : i32
    %c0_i32_1 = arith.constant 0 : i32
    return %c0_i32, %c0_i32_0 : i32, i32
  }
  func.func @transform_2(%arg0: i32) -> (i32, i32) {
    %c0_i32 = arith.constant 0 : i32
    %c0_i32_0 = arith.constant 0 : i32
    %c0_i32_1 = arith.constant 0 : i32
    return %c0_i32, %c0_i32_0 : i32, i32
  }
  func.func @transform_3(%arg0: i32) -> (i32, i32) {
    %c0_i32 = arith.constant 0 : i32
    %c0_i32_0 = arith.constant 0 : i32
    %c0_i32_1 = arith.constant 0 : i32
    return %c0_i32, %c0_i32_0 : i32, i32
  }
  func.func @transform_4(%arg0: i32) -> (i32, i32) {
    %c0_i32 = arith.constant 0 : i32
    %c0_i32_0 = arith.constant 0 : i32
    %c0_i32_1 = arith.constant 0 : i32
    return %c0_i32, %c0_i32_0 : i32, i32
  }
  func.func @transform_5(%arg0: i32) -> (i32, i32) {
    %c0_i32 = arith.constant 0 : i32
    %c0_i32_0 = arith.constant 0 : i32
    return %arg0, %c0_i32 : i32, i32
  }
}

</mosaic_0001>

<bundles_post_ra>
// kernel: nn_1_forward.1
= control target key start
LH: loop header
LB: loop body
LE: loop exit
PB: predicated region body
PF: predicated region fallthrough
CT: control target
= control target key end

     0   :  { %v2221_v0 = vmov 0.0|0.0   ;;  %vm2222_vm0 = vmmov 0   ;;  %v2223_v4 = vmov 0.0   ;;  %vm42_vm1 = vcmask 875520   ;;  %s2807_s1 = inlined_call_operand.vmem [shape: f32[107,128], index: 1, kind: input, shape index: {}]   ;;  %s2808_s0 = inlined_call_operand.vmem [shape: f32[8,107], index: 0, kind: input, shape index: {}]   ;;  %s2809_s3 = inlined_call_operand.vmem [shape: f32[128,8], index: 3, kind: input, shape index: {}]   ;;  %s2810_s2 = inlined_call_operand.vmem [shape: f32[1,128], index: 2, kind: input, shape index: {}]   ;;  %s2811_s4 = inlined_call_operand.vmem [shape: f32[1,8], index: 4, kind: input, shape index: {}]   ;;  %s2812_s5 = inlined_call_operand.vmem [shape: f32[8,8], index: 5, kind: output, shape index: {}]  }
   0x1   :  { %1926 = vmatprep.subr.bf16.mxu0 %v2221_v0  ;;  %v21_v1 = vld [vmem:[%s2807_s1] sm:$0xff]  ;;  %v22_v2 = vld [vmem:[%s2807_s1 + $0x8] sm:$0xff]  ;;  %v23_v3 = vld [vmem:[%s2807_s1 + $0x10] sm:$0xff]  ;;  %1558 = vmatprep.mubr.msk.f32.mxu0 %vm2222_vm0, %v2223_v4  ;;  %vm46_vm2 = vcmask 1042432   ;;  %vm1330_vm3 = vcmask 64512  }
   0x2   :  { %v51_v5 = vand.u32 4294901760, %v21_v1  ;;  %v54_v6 = vand.u32 4294901760, %v22_v2  ;;  %v24_v7 = vld [vmem:[%s2807_s1 + $0x18] sm:$0xff]  ;;  %v57_v8 = vand.u32 4294901760, %v23_v3  ;;  %2052 = vmatprep.subr.bf16.mxu1 %v2221_v0  ;;  %1748 = vmatprep.mubr.msk.f32.mxu1 %vm2222_vm0, %v2223_v4  ;;  %v25_v10 = vld [vmem:[%s2807_s1 + $0x20] sm:$0xff]  ;;  %v26_v11 = vld [vmem:[%s2807_s1 + $0x28] sm:$0xff] }
   0x3   :  { %v60_v9 = vand.u32 4294901760, %v24_v7  ;;  %v63_v14 = vand.u32 4294901760, %v25_v10  ;;  %v66_v15 = vand.u32 4294901760, %v26_v11  ;;  %v27_v16 = vld [vmem:[%s2807_s1 + $0x30] sm:$0xff]  ;;  %v28_v17 = vld [vmem:[%s2807_s1 + $0x38] sm:$0xff]  ;;  %v20_v18 = vld [vmem:[%s2808_s0] sm:$0xff] }
   0x4   :  { %v2278_v12 = vpack.c.bf16 %v54_v6, %v51_v5  ;;  %v69_v20 = vand.u32 4294901760, %v27_v16  ;;  %v72_v21 = vand.u32 4294901760, %v28_v17  ;;  %v44_v22 = vsel %vm42_vm1, %v20_v18, 0  ;;  %v29_v23 = vld [vmem:[%s2807_s1 + $0x40] sm:$0xff]  ;;  %v30_v24 = vld [vmem:[%s2807_s1 + $0x48] sm:$0xff]  ;;  %v31_v32 = vld [vmem:[%s2807_s1 + $0x50] sm:$0xff] }
   0x5   :  { %v2281_v13 = vpack.c.bf16 %v60_v9, %v57_v8  ;;  %v2294_v19 = vpack.c.bf16 %v66_v15, %v63_v14  ;;  %v2303_v25 = vsub.f32 %v21_v1, %v51_v5  ;;  %v2305_v26 = vsub.f32 %v22_v2, %v54_v6  ;;  %v34_v27 = vld [vmem:[%s2807_s1 + $0x68] sm:$0x7]  ;;  %v32_v33 = vld [vmem:[%s2807_s1 + $0x58] sm:$0xff]  ;;  %v33_v36 = vld [vmem:[%s2807_s1 + $0x60] sm:$0xff] }
   0x6   :  { %1928 = vmatpush3.bf16.msra.mxu0 %v2278_v12  ;;  %v2310_v28 = vand.u32 4294901760, %v44_v22  ;;  %v2313_v29 = vpack.c.bf16 %v72_v21, %v69_v20  ;;  %v75_v30 = vand.u32 4294901760, %v29_v23  ;;  %v78_v31 = vand.u32 4294901760, %v30_v24 }
   0x7   :  { %1929 = vmatprep.subr.bf16.mxu0 %v2221_v0  ;;  %v2321_v34 = vsub.f32 %v23_v3, %v57_v8  ;;  %v2323_v35 = vsub.f32 %v24_v7, %v60_v9  ;;  %v48_v37 = vsel %vm46_vm2, %v34_v27, 0  ;;  %v142_v39 = vand.u32 4294901760, %v2303_v25 }
   0x8   :  { %v2330_v38 = vsub.f32 %v44_v22, %v2310_v28  ;;  %v149_v40 = vand.u32 4294901760, %v2305_v26  ;;  %v81_v41 = vand.u32 4294901760, %v31_v32  ;;  %v84_v42 = vand.u32 4294901760, %v32_v33 }
   0x9   :  { %v2334_v43 = vsub.f32 %v25_v10, %v63_v14  ;;  %v2337_v44 = vpack.c.bf16 %v78_v31, %v75_v30  ;;  %v87_v45 = vand.u32 4294901760, %v33_v36  ;;  %v90_v46 = vand.u32 4294901760, %v48_v37 }
   0xa   :  { %1931 = vmatpush3.bf16.msra.mxu0 %v2281_v13  ;;  %v2339_v47 = vsub.f32 %v26_v11, %v66_v15  ;;  %v2341_v48 = vsub.f32 %v27_v16, %v69_v20  ;;  %v156_v49 = vand.u32 4294901760, %v2321_v34  ;;  %v163_v50 = vand.u32 4294901760, %v2323_v35 }
   0xb   :  { %1932 = vmatprep.subr.bf16.mxu0 %v2221_v0  ;;  %v2346_v51 = vsub.f32 %v28_v17, %v72_v21  ;;  %v131_v52 = vand.u32 4294901760, %v2330_v38  ;;  %v143_v53 = vsub.f32 %v2303_v25, %v142_v39  ;;  %v150_v54 = vsub.f32 %v2305_v26, %v149_v40 }
   0xc   :  { %v2351_v55 = vsub.f32 %v29_v23, %v75_v30  ;;  %v2353_v56 = vsub.f32 %v30_v24, %v78_v31  ;;  %v2355_v57 = vpack.c.bf16 %v84_v42, %v81_v41  ;;  %v2357_v58 = vsub.f32 %v31_v32, %v81_v41 }
   0xd   :  { %v2360_v59 = vsub.f32 %v32_v33, %v84_v42  ;;  %v2362_v60 = vpack.c.bf16 %v90_v46, %v87_v45  ;;  %v2364_v61 = vsub.f32 %v33_v36, %v87_v45  ;;  %v2366_v62 = vsub.f32 %v48_v37, %v90_v46 }
   0xe   :  { %1934 = vmatpush3.bf16.msra.mxu0 %v2294_v19  ;;  %v157_v63 = vsub.f32 %v2321_v34, %v156_v49  ;;  %v164_v1 = vsub.f32 %v2323_v35, %v163_v50  ;;  %v170_v2 = vand.u32 4294901760, %v2334_v43  ;;  %v177_v3 = vand.u32 4294901760, %v2339_v47 }
   0xf   :  { %1935 = vmatprep.subr.bf16.mxu0 %v2221_v0  ;;  %v132_v5 = vsub.f32 %v2330_v38, %v131_v52  ;;  %v144_v6 = vand.u32 4294901760, %v143_v53  ;;  %v151_v7 = vand.u32 4294901760, %v150_v54  ;;  %v184_v8 = vand.u32 4294901760, %v2341_v48 }
  0x10   :  { %v191_v9 = vand.u32 4294901760, %v2346_v51  ;;  %v198_v10 = vand.u32 4294901760, %v2351_v55  ;;  %v205_v11 = vand.u32 4294901760, %v2353_v56  ;;  %v212_v14 = vand.u32 4294901760, %v2357_v58 }
  0x11   :  { %v219_v15 = vand.u32 4294901760, %v2360_v59  ;;  %v226_v16 = vand.u32 4294901760, %v2364_v61  ;;  %v233_v17 = vand.u32 4294901760, %v2366_v62  ;;  %v2385_v18 = vpack.c.bf16 %v149_v40, %v142_v39 }
  0x12   :  { %1937 = vmatpush3.bf16.msra.mxu0 %v2313_v29  ;;  %v2388_v20 = vpack.c.bf16 %v163_v50, %v156_v49  ;;  %v2390_v21 = vpack.c.bf16 %v177_v3, %v170_v2  ;;  %v2392_v22 = vpack.c.bf16 %v191_v9, %v184_v8  ;;  %v2394_v23 = vpack.c.bf16 %v205_v11, %v198_v10 }
  0x13   :  { %1938 = vmatprep.subr.bf16.mxu0 %v2221_v0  ;;  %v2396_v24 = vpack.c.bf16 %v219_v15, %v212_v14  ;;  %v2398_v27 = vpack.c.bf16 %v233_v17, %v226_v16  ;;  %v133_v30 = vand.u32 4294901760, %v132_v5  ;;  %v158_v31 = vand.u32 4294901760, %v157_v63 }
  0x14   :  { %v1948_v32 = vpack.c.bf16 %v151_v7, %v144_v6  ;;  %v165_v33 = vand.u32 4294901760, %v164_v1  ;;  %v171_v36 = vsub.f32 %v2334_v43, %v170_v2  ;;  %v178_v37 = vsub.f32 %v2339_v47, %v177_v3 }
  0x15   :  { %v185_v39 = vsub.f32 %v2341_v48, %v184_v8  ;;  %v192_v45 = vsub.f32 %v2346_v51, %v191_v9  ;;  %v199_v46 = vsub.f32 %v2351_v55, %v198_v10  ;;  %v206_v54 = vsub.f32 %v2353_v56, %v205_v11 }
  0x16   :  { %1940 = vmatpush3.bf16.msra.mxu0 %v2337_v44  ;;  %v1951_v40 = vpack.c.bf16 %v165_v33, %v158_v31  ;;  %v172_v41 = vand.u32 4294901760, %v171_v36  ;;  %v179_v42 = vand.u32 4294901760, %v178_v37  ;;  %v213_v1 = vsub.f32 %v2357_v58, %v212_v14  ;;  %v666_v14 = vld [vmem:[%s2809_s3] sm:$0xff]  ;;  %v671_v37 = vld [vmem:[%s2809_s3 + $0x28] sm:$0xff] }
  0x17   :  { %1941 = vmatprep.subr.bf16.mxu0 %v2221_v0  ;;  %v186_v50 = vand.u32 4294901760, %v185_v39  ;;  %v193_v53 = vand.u32 4294901760, %v192_v45  ;;  %v200_v63 = vand.u32 4294901760, %v199_v46  ;;  %v220_v2 = vsub.f32 %v2360_v59, %v219_v15  ;;  %v667_v15 = vld [vmem:[%s2809_s3 + $0x8] sm:$0xff]  ;;  %v670_v36 = vld [vmem:[%s2809_s3 + $0x20] sm:$0xff]  ;;  %v673_v45 = vld [vmem:[%s2809_s3 + $0x38] sm:$0xff] }
  0x18   :  { %v1954_v49 = vpack.c.bf16 %v179_v42, %v172_v41  ;;  %v207_v5 = vand.u32 4294901760, %v206_v54  ;;  %v227_v6 = vsub.f32 %v2364_v61, %v226_v16  ;;  %v234_v7 = vsub.f32 %v2366_v62, %v233_v17  ;;  %v668_v16 = vld [vmem:[%s2809_s3 + $0x10] sm:$0xff]  ;;  %v674_v46 = vld [vmem:[%s2809_s3 + $0x40] sm:$0xff] }
  0x19   :  { %v1957_v3 = vpack.c.bf16 %v193_v53, %v186_v50  ;;  %v214_v8 = vand.u32 4294901760, %v213_v1  ;;  %v221_v10 = vand.u32 4294901760, %v220_v2  ;;  %v690_v17 = vand.u32 4294901760, %v666_v14  ;;  %v672_v42 = vld [vmem:[%s2809_s3 + $0x30] sm:$0xff] }
  0x1a   :  { %1943 = vmatpush3.bf16.msra.mxu0 %v2355_v57  ;;  %v1960_v9 = vpack.c.bf16 %v207_v5, %v200_v63  ;;  %v228_v11 = vand.u32 4294901760, %v227_v6  ;;  %v693_v31 = vand.u32 4294901760, %v667_v15  ;;  %v696_v33 = vand.u32 4294901760, %v668_v16  ;;  %v675_v63 = vld [vmem:[%s2809_s3 + $0x48] sm:$0xff] }
  0x1b   :  { %1944 = vmatprep.subr.bf16.mxu0 %v2221_v0  ;;  %v705_v41 = vand.u32 4294901760, %v671_v37  ;;  %v2447_v50 = vsub.f32 %v666_v14, %v690_v17  ;;  %v1963_v1 = vpack.c.bf16 %v221_v10, %v214_v8  ;;  %v711_v14 = vand.u32 4294901760, %v673_v45 }
  0x1c   :  { %v2449_v53 = vsub.f32 %v667_v15, %v693_v31  ;;  %v2451_v54 = vsub.f32 %v668_v16, %v696_v33  ;;  %v714_v15 = vand.u32 4294901760, %v674_v46  ;;  %v717_v16 = vand.u32 4294901760, %v675_v63 }
  0x1d   :  { %v2464_v6 = vsub.f32 %v671_v37, %v705_v41  ;;  %v2469_v8 = vsub.f32 %v673_v45, %v711_v14 }
  0x1e   :  { %1946 = vmatpush3.bf16.msra.mxu0 %v2362_v60  ;;  %v2471_v10 = vsub.f32 %v674_v46, %v714_v15  ;;  %v797_v37 = vand.u32 4294901760, %v2451_v54 }
  0x1f   :  { %1947 = vmatprep.subr.bf16.mxu0 %v2221_v0 }
  0x21   :  { %1559 = vmatmul.mubr.f32.vlgmr.msra.gmra.mrb[0].mxu0 %v133_v30  ;;  %v235_v30 = vand.u32 4294901760, %v234_v7  ;;  %v708_v7 = vand.u32 4294901760, %v672_v42 }
  0x22   :  { %1949 = vmatpush3.bf16.msra.mxu0 %v1948_v32  ;;  %1589 = vmatprep.mubr.msk.f32.mxu0 %vm2222_vm0, %v2223_v4  ;;  %v669_v32 = vld [vmem:[%s2809_s3 + $0x18] sm:$0xff] }
  0x23   :  { %1950 = vmatprep.subr.bf16.mxu0 %v2221_v0  ;;  %v699_v39 = vand.u32 4294901760, %v669_v32 }
  0x25   :  { %v2456_v2 = vpack.c.bf16 %v699_v39, %v696_v33  ;;  %v1969_v33 = vpack.c.bf16 %v2305_v26, %v2303_v25  ;;  %v2494_v25 = vpack.c.bf16 %v717_v16, %v714_v15  ;;  %v1975_v26 = vpack.c.bf16 %v2339_v47, %v2334_v43 }
  0x26   :  { %1952 = vmatpush3.bf16.msra.mxu0 %v1951_v40  ;;  %v702_v40 = vand.u32 4294901760, %v670_v36  ;;  %v1984_v43 = vpack.c.bf16 %v2360_v59, %v2357_v58  ;;  %v1987_v47 = vpack.c.bf16 %v2366_v62, %v2364_v61 }
  0x27   :  { %1953 = vmatprep.subr.bf16.mxu0 %v2221_v0 }
  0x28   :  { %v2460_v5 = vsub.f32 %v670_v36, %v702_v40  ;;  %v2484_v36 = vpack.c.bf16 %v711_v14, %v708_v7 }
  0x2a   :  { %1955 = vmatpush3.bf16.msra.mxu0 %v1954_v49  ;;  %v2445_v49 = vpack.c.bf16 %v693_v31, %v690_v17  ;;  %v1966_v17 = vpack.c.bf16 %v235_v30, %v228_v11  ;;  %v2473_v31 = vsub.f32 %v675_v63, %v717_v16  ;;  %v1972_v11 = vpack.c.bf16 %v2323_v35, %v2321_v34 }
  0x2b   :  { %1956 = vmatprep.subr.bf16.mxu0 %v2221_v0  ;;  %v1978_v34 = vpack.c.bf16 %v2346_v51, %v2341_v48  ;;  %v1981_v35 = vpack.c.bf16 %v2353_v56, %v2351_v55  ;;  %v680_v55 = vld [vmem:[%s2809_s3 + $0x70] sm:$0xff]  ;;  %v681_v56 = vld [vmem:[%s2809_s3 + $0x78] sm:$0xff] }
  0x2c   :  { %2054 = vmatpush3.bf16.msra.mxu1 %v2445_v49  ;;  %v732_v61 = vand.u32 4294901760, %v680_v55  ;;  %v735_v62 = vand.u32 4294901760, %v681_v56 }
  0x2d   :  { %2055 = vmatprep.subr.bf16.mxu1 %v2221_v0 }
  0x2e   :  { %1958 = vmatpush3.bf16.msra.mxu0 %v1957_v3  ;;  %v2458_v3 = vsub.f32 %v669_v32, %v699_v39  ;;  %v2477_v32 = vpack.c.bf16 %v705_v41, %v702_v40  ;;  %v798_v41 = vsub.f32 %v2451_v54, %v797_v37 }
  0x2f   :  { %1959 = vmatprep.subr.bf16.mxu0 %v2221_v0 }
  0x30   :  { %2057 = vmatpush3.bf16.msra.mxu1 %v2456_v2  ;;  %v804_v39 = vand.u32 4294901760, %v2458_v3  ;;  %v799_v46 = vand.u32 4294901760, %v798_v41 }
  0x31   :  { %2058 = vmatprep.subr.bf16.mxu1 %v2221_v0 }
  0x32   :  { %1961 = vmatpush3.bf16.msra.mxu0 %v1960_v9  ;;  %v2467_v9 = vsub.f32 %v672_v42, %v708_v7  ;;  %v805_v42 = vsub.f32 %v2458_v3, %v804_v39  ;;  %v818_v7 = vand.u32 4294901760, %v2464_v6 }
  0x33   :  { %1962 = vmatprep.subr.bf16.mxu0 %v2221_v0 }
  0x34   :  { %2060 = vmatpush3.bf16.msra.mxu1 %v2477_v32  ;;  %v806_v63 = vand.u32 4294901760, %v805_v42  ;;  %v819_v16 = vsub.f32 %v2464_v6, %v818_v7 }
  0x35   :  { %2061 = vmatprep.subr.bf16.mxu1 %v2221_v0 }
  0x36   :  { %1964 = vmatpush3.bf16.msra.mxu0 %v1963_v1  ;;  %v811_v1 = vand.u32 4294901760, %v2460_v5  ;;  %v2629_v14 = vpack.c.bf16 %v806_v63, %v799_v46 }
  0x37   :  { %1965 = vmatprep.subr.bf16.mxu0 %v2221_v0 }
  0x38   :  { %2063 = vmatpush3.bf16.msra.mxu1 %v2484_v36  ;;  %v812_v15 = vsub.f32 %v2460_v5, %v811_v1 }
  0x39   :  { %2064 = vmatprep.subr.bf16.mxu1 %v2221_v0 }
  0x3a   :  { %1967 = vmatpush3.bf16.msra.mxu0 %v1966_v17  ;;  %v813_v17 = vand.u32 4294901760, %v812_v15 }
  0x3b   :  { %1968 = vmatprep.subr.bf16.mxu0 %v2221_v0 }
  0x3c   :  { %2066 = vmatpush3.bf16.msra.mxu1 %v2494_v25 }
  0x3d   :  { %1590 = vmatmul.mubr.f32.vlgmr.msra.gmra.mrb[0].mxu0 %v2310_v28  ;;  %2067 = vmatprep.subr.bf16.mxu1 %v2221_v0 }
  0x3e   :  { %1970 = vmatpush3.bf16.msra.mxu0 %v1969_v33  ;;  %1620 = vmatprep.mubr.msk.f32.mxu0 %vm2222_vm0, %v2223_v4  ;;  %v820_v33 = vand.u32 4294901760, %v819_v16 }
  0x3f   :  { %1971 = vmatprep.subr.bf16.mxu0 %v2221_v0 }
  0x42   :  { %1973 = vmatpush3.bf16.msra.mxu0 %v1972_v11  ;;  %v825_v11 = vand.u32 4294901760, %v2467_v9 }
  0x43   :  { %1974 = vmatprep.subr.bf16.mxu0 %v2221_v0 }
  0x46   :  { %1976 = vmatpush3.bf16.msra.mxu0 %v1975_v26  ;;  %v832_v26 = vand.u32 4294901760, %v2469_v8 }
  0x47   :  { %1977 = vmatprep.subr.bf16.mxu0 %v2221_v0 }
  0x4a   :  { %1979 = vmatpush3.bf16.msra.mxu0 %v1978_v34  ;;  %v2083_v34 = vpack.c.bf16 %v820_v33, %v813_v17 }
  0x4b   :  { %1980 = vmatprep.subr.bf16.mxu0 %v2221_v0 }
  0x4e   :  { %1982 = vmatpush3.bf16.msra.mxu0 %v1981_v35  ;;  %v826_v35 = vsub.f32 %v2467_v9, %v825_v11 }
  0x4f   :  { %1983 = vmatprep.subr.bf16.mxu0 %v2221_v0 }
  0x52   :  { %1985 = vmatpush3.bf16.msra.mxu0 %v1984_v43  ;;  %v833_v43 = vsub.f32 %v2469_v8, %v832_v26 }
  0x53   :  { %1986 = vmatprep.subr.bf16.mxu0 %v2221_v0 }
  0x56   :  { %1988 = vmatpush3.bf16.msra.mxu0 %v1987_v47  ;;  %v827_v47 = vand.u32 4294901760, %v826_v35 }
  0x57   :  { %1989 = vmatprep.subr.bf16.mxu0 %v2221_v0 }
  0x59   :  { %1621 = vmatmul.mubr.f32.vlgmr.msra.gmra.mrb[0].mxu0 %v2330_v38 }
  0x5a   :  { %1991 = vmatpush3.bf16.msra.mxu0 %v2278_v12  ;;  %1651 = vmatprep.mubr.msk.f32.mxu0 %vm2222_vm0, %v2223_v4 }
  0x5b   :  { %1992 = vmatprep.subr.bf16.mxu0 %v2221_v0 }
  0x5e   :  { %1994 = vmatpush3.bf16.msra.mxu0 %v2281_v13 }
  0x5f   :  { %1995 = vmatprep.subr.bf16.mxu0 %v2221_v0 }
  0x62   :  { %1997 = vmatpush3.bf16.msra.mxu0 %v2294_v19 }
  0x63   :  { %1998 = vmatprep.subr.bf16.mxu0 %v2221_v0 }
  0x66   :  { %2000 = vmatpush3.bf16.msra.mxu0 %v2313_v29 }
  0x67   :  { %2001 = vmatprep.subr.bf16.mxu0 %v2221_v0 }
  0x6a   :  { %2003 = vmatpush3.bf16.msra.mxu0 %v2337_v44 }
  0x6b   :  { %2004 = vmatprep.subr.bf16.mxu0 %v2221_v0 }
  0x6e   :  { %2006 = vmatpush3.bf16.msra.mxu0 %v2355_v57 }
  0x6f   :  { %2007 = vmatprep.subr.bf16.mxu0 %v2221_v0 }
  0x72   :  { %2009 = vmatpush3.bf16.msra.mxu0 %v2362_v60 }
  0x73   :  { %2010 = vmatprep.subr.bf16.mxu0 %v2221_v0 }
  0x75   :  { %1652 = vmatmul.mubr.f32.vlgmr.msra.gmra.mrb[0].mxu0 %v131_v52 }
  0x76   :  { %2012 = vmatpush3.bf16.msra.mxu0 %v2385_v18  ;;  %1682 = vmatprep.mubr.msk.f32.mxu0 %vm2222_vm0, %v2223_v4  ;;  %v783_v18 = vand.u32 4294901760, %v2447_v50 }
  0x77   :  { %2013 = vmatprep.subr.bf16.mxu0 %v2221_v0 }
  0x7a   :  { %2015 = vmatpush3.bf16.msra.mxu0 %v2388_v20  ;;  %v790_v20 = vand.u32 4294901760, %v2449_v53 }
  0x7b   :  { %2016 = vmatprep.subr.bf16.mxu0 %v2221_v0 }
  0x7e   :  { %2018 = vmatpush3.bf16.msra.mxu0 %v2390_v21  ;;  %v2603_v21 = vpack.c.bf16 %v735_v62, %v732_v61 }
  0x7f   :  { %2019 = vmatprep.subr.bf16.mxu0 %v2221_v0 }
  0x82   :  { %2021 = vmatpush3.bf16.msra.mxu0 %v2392_v22  ;;  %v2605_v22 = vsub.f32 %v680_v55, %v732_v61 }
  0x83   :  { %2022 = vmatprep.subr.bf16.mxu0 %v2221_v0 }
  0x84   :  { %v2814_v17 = vand.u32 4294901760, %v2605_v22 }
  0x86   :  { %2024 = vmatpush3.bf16.msra.mxu0 %v2394_v23  ;;  %v2607_v23 = vsub.f32 %v681_v56, %v735_v62 }
  0x87   :  { %2025 = vmatprep.subr.bf16.mxu0 %v2221_v0 }
  0x88   :  { %v2813_v33 = vand.u32 4294901760, %v2607_v23 }
  0x8a   :  { %2027 = vmatpush3.bf16.msra.mxu0 %v2396_v24  ;;  %v784_v24 = vsub.f32 %v2447_v50, %v783_v18 }
  0x8b   :  { %2028 = vmatprep.subr.bf16.mxu0 %v2221_v0 }
  0x8c   :  { %v785_v30 = vand.u32 4294901760, %v784_v24 }
  0x8e   :  { %2030 = vmatpush3.bf16.msra.mxu0 %v2398_v27  ;;  %v791_v27 = vsub.f32 %v2449_v53, %v790_v20 }
  0x8f   :  { %2031 = vmatprep.subr.bf16.mxu0 %v2221_v0 }
  0x90   :  { %v792_v40 = vand.u32 4294901760, %v791_v27 }
  0x91   :  { %1683 = vmatmul.mubr.f32.vlgmr.msra.gmra.mrb[0].mxu0 %v2310_v28 }
  0x92   :  { %2033 = vmatpush3.bf16.msra.mxu0 %v2278_v12  ;;  %1713 = vmatprep.mubr.msk.f32.mxu0 %vm2222_vm0, %v2223_v4  ;;  %v676_v12 = vld [vmem:[%s2809_s3 + $0x50] sm:$0xff]  ;;  %v2625_v45 = vpack.c.bf16 %v792_v40, %v785_v30 }
  0x93   :  { %2034 = vmatprep.subr.bf16.mxu0 %v2221_v0 }
  0x96   :  { %2036 = vmatpush3.bf16.msra.mxu0 %v2281_v13  ;;  %v677_v13 = vld [vmem:[%s2809_s3 + $0x58] sm:$0xff] }
  0x97   :  { %2037 = vmatprep.subr.bf16.mxu0 %v2221_v0 }
  0x9a   :  { %2039 = vmatpush3.bf16.msra.mxu0 %v2294_v19  ;;  %v720_v19 = vand.u32 4294901760, %v676_v12 }
  0x9b   :  { %2040 = vmatprep.subr.bf16.mxu0 %v2221_v0 }
  0x9e   :  { %2042 = vmatpush3.bf16.msra.mxu0 %v2313_v29  ;;  %v723_v29 = vand.u32 4294901760, %v677_v13 }
  0x9f   :  { %2043 = vmatprep.subr.bf16.mxu0 %v2221_v0 }
  0xa0   :  { %v2573_v38 = vpack.c.bf16 %v723_v29, %v720_v19  ;;  %v2593_v58 = vsub.f32 %v677_v13, %v723_v29  ;;  %v839_v13 = vand.u32 4294901760, %v2471_v10 }
  0xa2   :  { %2045 = vmatpush3.bf16.msra.mxu0 %v2337_v44  ;;  %v678_v44 = vld [vmem:[%s2809_s3 + $0x60] sm:$0xff]  ;;  %2069 = vmatpush3.bf16.msra.mxu1 %v2573_v38  ;;  %v860_v56 = vand.u32 4294901760, %v2593_v58 }
  0xa3   :  { %2046 = vmatprep.subr.bf16.mxu0 %v2221_v0  ;;  %v726_v48 = vand.u32 4294901760, %v678_v44  ;;  %2070 = vmatprep.subr.bf16.mxu1 %v2221_v0 }
  0xa4   :  { %v861_v24 = vsub.f32 %v2593_v58, %v860_v56 }
  0xa5   :  { %v2596_v59 = vsub.f32 %v678_v44, %v726_v48  ;;  %v840_v44 = vsub.f32 %v2471_v10, %v839_v13 }
  0xa6   :  { %2048 = vmatpush3.bf16.msra.mxu0 %v2355_v57  ;;  %v2591_v57 = vsub.f32 %v676_v12, %v720_v19  ;;  %v834_v12 = vand.u32 4294901760, %v833_v43  ;;  %v846_v19 = vand.u32 4294901760, %v2473_v31  ;;  %v862_v30 = vand.u32 4294901760, %v861_v24 }
  0xa7   :  { %2049 = vmatprep.subr.bf16.mxu0 %v2221_v0  ;;  %v2816_v40 = vand.u32 4294901760, %v2596_v59  ;;  %v882_v43 = vsub.f32 %v2605_v22, %v2814_v17  ;;  %v2110_v24 = vpack.c.bf16 %v2469_v8, %v2467_v9  ;;  %v2819_v8 = vand.u32 4294901760, %v2605_v22 }
  0xa8   :  { %v2086_v29 = vpack.c.bf16 %v834_v12, %v827_v47  ;;  %v853_v55 = vand.u32 4294901760, %v2591_v57  ;;  %v889_v47 = vsub.f32 %v2607_v23, %v2813_v33 }
  0xa9   :  { %v868_v46 = vsub.f32 %v2596_v59, %v2816_v40  ;;  %v883_v12 = vand.u32 4294901760, %v882_v43 }
  0xaa   :  { %2051 = vmatpush3.bf16.msra.mxu0 %v2362_v60  ;;  %v854_v62 = vsub.f32 %v2591_v57, %v853_v55 }
  0xab   :  { %v869_v15 = vand.u32 4294901760, %v868_v46 }
  0xac   :  { %v855_v27 = vand.u32 4294901760, %v854_v62  ;;  %v2107_v62 = vpack.c.bf16 %v2464_v6, %v2460_v5  ;;  %v2817_v5 = vand.u32 4294901760, %v2596_v59 }
  0xad   :  { %1714 = vmatmul.mubr.f32.vlgmr.msra.gmra.mrb[0].mxu0 %v2310_v28  ;;  %v679_v28 = vld [vmem:[%s2809_s3 + $0x68] sm:$0xff] }
  0xae   :  { %v729_v51 = vand.u32 4294901760, %v679_v28  ;;  %v2092_v42 = vpack.c.bf16 %v862_v30, %v855_v27  ;;  %v2113_v27 = vpack.c.bf16 %v2473_v31, %v2471_v10  ;;  %v2116_v30 = vpack.c.bf16 %v2593_v58, %v2591_v57 }
  0xaf   :  { %v2820_v10 = vand.u32 4294901760, %v2607_v23 }
  0xb0   :  { %v2583_v52 = vpack.c.bf16 %v729_v51, %v726_v48  ;;  %v2598_v60 = vsub.f32 %v679_v28, %v729_v51  ;;  %v847_v28 = vsub.f32 %v2473_v31, %v846_v19  ;;  %v841_v48 = vand.u32 4294901760, %v840_v44 }
  0xb1   :  { %v890_v44 = vand.u32 4294901760, %v889_v47  ;;  %v2170_v31 = vpack.c.bf16 %v2820_v10, %v2819_v8 }
  0xb2   :  { %2072 = vmatpush3.bf16.msra.mxu1 %v2583_v52  ;;  %v848_v51 = vand.u32 4294901760, %v847_v28  ;;  %v2815_v41 = vand.u32 4294901760, %v2598_v60  ;;  %v2119_v46 = vpack.c.bf16 %v2598_v60, %v2596_v59  ;;  %v2818_v6 = vand.u32 4294901760, %v2598_v60 }
  0xb3   :  { %2073 = vmatprep.subr.bf16.mxu1 %v2221_v0  ;;  %v2098_v28 = vpack.c.bf16 %v890_v44, %v883_v12 }
  0xb4   :  { %v2089_v61 = vpack.c.bf16 %v848_v51, %v841_v48  ;;  %v875_v63 = vsub.f32 %v2598_v60, %v2815_v41  ;;  %v2101_v48 = vpack.c.bf16 %v2449_v53, %v2447_v50  ;;  %v2104_v51 = vpack.c.bf16 %v2458_v3, %v2451_v54 }
  0xb5   :  { %v2155_v50 = vpack.c.bf16 %v818_v7, %v811_v1  ;;  %v2158_v53 = vpack.c.bf16 %v832_v26, %v825_v11  ;;  %v2161_v54 = vpack.c.bf16 %v846_v19, %v839_v13  ;;  %v2164_v3 = vpack.c.bf16 %v860_v56, %v853_v55 }
  0xb6   :  { %2075 = vmatpush3.bf16.msra.mxu1 %v2603_v21  ;;  %v876_v16 = vand.u32 4294901760, %v875_v63  ;;  %v2122_v63 = vpack.c.bf16 %v2607_v23, %v2605_v22  ;;  %v2167_v9 = vpack.c.bf16 %v2818_v6, %v2817_v5 }
  0xb7   :  { %2076 = vmatprep.subr.bf16.mxu1 %v2221_v0 }
  0xb8   :  { %v2095_v35 = vpack.c.bf16 %v876_v16, %v869_v15  ;;  %v1336_v15 = vld [vmem:[%s2810_s2] ss:$0 sm:$0xff] }
 0x180   :  { %v661_v16 = vpop.f32.mrb[0].mxu0 }
 0x181   :  { %v2196_v43 = vadd.f32 %v1336_v15, %v661_v16  ;;  %v1715_v47 = vpop.f32.mrb[1].mxu0 }
 0x183   :  { %v665_v12 = vmax.f32 %v2196_v43, 0.0 }
 0x185   :  { %v2696_v44 = vand.u32 4294901760, %v665_v12 }
 0x187   :  { %v771_v33 = vsub.f32 %v665_v12, %v2696_v44 }
 0x189   :  { %v772_v17 = vand.u32 4294901760, %v771_v33 }
 0x18b   :  { %v773_v41 = vsub.f32 %v771_v33, %v772_v17 }
 0x18d   :  { %v774_v40 = vand.u32 4294901760, %v773_v41 }
 0x18f   :  { %1749 = vmatmul.mubr.f32.vlgmr.msra.gmra.mrb[0].mxu1 %v774_v40 }
 0x190   :  { %2078 = vmatpush3.bf16.msra.mxu1 %v2625_v45  ;;  %1783 = vmatprep.mubr.msk.f32.mxu1 %vm2222_vm0, %v2223_v4  ;;  %v2149_v45 = vpack.c.bf16 %v790_v20, %v783_v18 }
 0x191   :  { %2079 = vmatprep.subr.bf16.mxu1 %v2221_v0 }
 0x194   :  { %2081 = vmatpush3.bf16.msra.mxu1 %v2629_v14  ;;  %v2152_v14 = vpack.c.bf16 %v804_v39, %v797_v37 }
 0x195   :  { %2082 = vmatprep.subr.bf16.mxu1 %v2221_v0 }
 0x198   :  { %2084 = vmatpush3.bf16.msra.mxu1 %v2083_v34 }
 0x199   :  { %2085 = vmatprep.subr.bf16.mxu1 %v2221_v0 }
 0x19c   :  { %2087 = vmatpush3.bf16.msra.mxu1 %v2086_v29 }
 0x19d   :  { %2088 = vmatprep.subr.bf16.mxu1 %v2221_v0 }
 0x1a0   :  { %2090 = vmatpush3.bf16.msra.mxu1 %v2089_v61 }
 0x1a1   :  { %2091 = vmatprep.subr.bf16.mxu1 %v2221_v0 }
 0x1a4   :  { %2093 = vmatpush3.bf16.msra.mxu1 %v2092_v42 }
 0x1a5   :  { %2094 = vmatprep.subr.bf16.mxu1 %v2221_v0 }
 0x1a8   :  { %2096 = vmatpush3.bf16.msra.mxu1 %v2095_v35 }
 0x1a9   :  { %2097 = vmatprep.subr.bf16.mxu1 %v2221_v0 }
 0x1ac   :  { %2099 = vmatpush3.bf16.msra.mxu1 %v2098_v28 }
 0x1ad   :  { %2100 = vmatprep.subr.bf16.mxu1 %v2221_v0 }
 0x1af   :  { %1784 = vmatmul.mubr.f32.vlgmr.msra.gmra.mrb[0].mxu1 %v2696_v44 }
 0x1b0   :  { %2102 = vmatpush3.bf16.msra.mxu1 %v2101_v48  ;;  %1818 = vmatprep.mubr.msk.f32.mxu1 %vm2222_vm0, %v2223_v4 }
 0x1b1   :  { %2103 = vmatprep.subr.bf16.mxu1 %v2221_v0 }
 0x1b4   :  { %2105 = vmatpush3.bf16.msra.mxu1 %v2104_v51 }
 0x1b5   :  { %2106 = vmatprep.subr.bf16.mxu1 %v2221_v0 }
 0x1b8   :  { %2108 = vmatpush3.bf16.msra.mxu1 %v2107_v62 }
 0x1b9   :  { %2109 = vmatprep.subr.bf16.mxu1 %v2221_v0 }
 0x1bc   :  { %2111 = vmatpush3.bf16.msra.mxu1 %v2110_v24 }
 0x1bd   :  { %2112 = vmatprep.subr.bf16.mxu1 %v2221_v0 }
 0x1c0   :  { %2114 = vmatpush3.bf16.msra.mxu1 %v2113_v27 }
 0x1c1   :  { %2115 = vmatprep.subr.bf16.mxu1 %v2221_v0 }
 0x1c4   :  { %2117 = vmatpush3.bf16.msra.mxu1 %v2116_v30 }
 0x1c5   :  { %2118 = vmatprep.subr.bf16.mxu1 %v2221_v0 }
 0x1c8   :  { %2120 = vmatpush3.bf16.msra.mxu1 %v2119_v46 }
 0x1c9   :  { %2121 = vmatprep.subr.bf16.mxu1 %v2221_v0 }
 0x1cc   :  { %2123 = vmatpush3.bf16.msra.mxu1 %v2122_v63 }
 0x1cd   :  { %2124 = vmatprep.subr.bf16.mxu1 %v2221_v0 }
 0x1cf   :  { %1819 = vmatmul.mubr.f32.vlgmr.msra.gmra.mrb[0].mxu1 %v771_v33 }
 0x1d0   :  { %2126 = vmatpush3.bf16.msra.mxu1 %v2445_v49  ;;  %1853 = vmatprep.mubr.msk.f32.mxu1 %vm2222_vm0, %v2223_v4 }
 0x1d1   :  { %2127 = vmatprep.subr.bf16.mxu1 %v2221_v0 }
 0x1d4   :  { %2129 = vmatpush3.bf16.msra.mxu1 %v2456_v2 }
 0x1d5   :  { %2130 = vmatprep.subr.bf16.mxu1 %v2221_v0 }
 0x1d8   :  { %2132 = vmatpush3.bf16.msra.mxu1 %v2477_v32 }
 0x1d9   :  { %2133 = vmatprep.subr.bf16.mxu1 %v2221_v0 }
 0x1dc   :  { %2135 = vmatpush3.bf16.msra.mxu1 %v2484_v36 }
 0x1dd   :  { %2136 = vmatprep.subr.bf16.mxu1 %v2221_v0 }
 0x1e0   :  { %2138 = vmatpush3.bf16.msra.mxu1 %v2494_v25 }
 0x1e1   :  { %2139 = vmatprep.subr.bf16.mxu1 %v2221_v0 }
 0x1e4   :  { %2141 = vmatpush3.bf16.msra.mxu1 %v2573_v38 }
 0x1e5   :  { %2142 = vmatprep.subr.bf16.mxu1 %v2221_v0 }
 0x1e8   :  { %2144 = vmatpush3.bf16.msra.mxu1 %v2583_v52 }
 0x1e9   :  { %2145 = vmatprep.subr.bf16.mxu1 %v2221_v0 }
 0x1ec   :  { %2147 = vmatpush3.bf16.msra.mxu1 %v2603_v21 }
 0x1ed   :  { %2148 = vmatprep.subr.bf16.mxu1 %v2221_v0 }
 0x1ef   :  { %1854 = vmatmul.mubr.f32.vlgmr.msra.gmra.mrb[0].mxu1 %v772_v17 }
 0x1f0   :  { %2150 = vmatpush3.bf16.msra.mxu1 %v2149_v45  ;;  %1888 = vmatprep.mubr.msk.f32.mxu1 %vm2222_vm0, %v2223_v4 }
 0x1f1   :  { %2151 = vmatprep.subr.bf16.mxu1 %v2221_v0 }
 0x1f4   :  { %2153 = vmatpush3.bf16.msra.mxu1 %v2152_v14 }
 0x1f5   :  { %2154 = vmatprep.subr.bf16.mxu1 %v2221_v0 }
 0x1f8   :  { %2156 = vmatpush3.bf16.msra.mxu1 %v2155_v50 }
 0x1f9   :  { %2157 = vmatprep.subr.bf16.mxu1 %v2221_v0 }
 0x1fc   :  { %2159 = vmatpush3.bf16.msra.mxu1 %v2158_v53 }
 0x1fd   :  { %2160 = vmatprep.subr.bf16.mxu1 %v2221_v0 }
 0x200   :  { %2162 = vmatpush3.bf16.msra.mxu1 %v2161_v54 }
 0x201   :  { %2163 = vmatprep.subr.bf16.mxu1 %v2221_v0 }
 0x204   :  { %2165 = vmatpush3.bf16.msra.mxu1 %v2164_v3 }
 0x205   :  { %2166 = vmatprep.subr.bf16.mxu1 %v2221_v0 }
 0x208   :  { %2168 = vmatpush3.bf16.msra.mxu1 %v2167_v9 }
 0x209   :  { %2169 = vmatprep.subr.bf16.mxu1 %v2221_v0 }
 0x20c   :  { %2171 = vmatpush3.bf16.msra.mxu1 %v2170_v31 }
 0x20d   :  { %2172 = vmatprep.subr.bf16.mxu1 %v2221_v0 }
 0x20f   :  { %1889 = vmatmul.mubr.f32.vlgmr.msra.gmra.mrb[0].mxu1 %v2696_v44 }
 0x210   :  { %2174 = vmatpush3.bf16.msra.mxu1 %v2445_v49  ;;  %1923 = vmatprep.mubr.msk.f32.mxu1 %vm2222_vm0, %v2223_v4  ;;  %v1337_v4 = vld [vmem:[%s2811_s4] ss:$0 sm:$0xff] }
 0x211   :  { %2175 = vmatprep.subr.bf16.mxu1 %v2221_v0 }
 0x214   :  { %2177 = vmatpush3.bf16.msra.mxu1 %v2456_v2 }
 0x215   :  { %2178 = vmatprep.subr.bf16.mxu1 %v2221_v0 }
 0x218   :  { %2180 = vmatpush3.bf16.msra.mxu1 %v2477_v32 }
 0x219   :  { %2181 = vmatprep.subr.bf16.mxu1 %v2221_v0 }
 0x21c   :  { %2183 = vmatpush3.bf16.msra.mxu1 %v2484_v36 }
 0x21d   :  { %2184 = vmatprep.subr.bf16.mxu1 %v2221_v0 }
 0x220   :  { %2186 = vmatpush3.bf16.msra.mxu1 %v2494_v25 }
 0x221   :  { %2187 = vmatprep.subr.bf16.mxu1 %v2221_v0 }
 0x224   :  { %2189 = vmatpush3.bf16.msra.mxu1 %v2573_v38 }
 0x225   :  { %2190 = vmatprep.subr.bf16.mxu1 %v2221_v0 }
 0x228   :  { %2192 = vmatpush3.bf16.msra.mxu1 %v2583_v52 }
 0x229   :  { %2193 = vmatprep.subr.bf16.mxu1 %v2221_v0 }
 0x22c   :  { %2195 = vmatpush3.bf16.msra.mxu1 %v2603_v21 }
 0x22f   :  { %1924 = vmatmul.mubr.f32.vlgmr.msra.gmra.mrb[0].mxu1 %v2696_v44 }
 0x302   :  { %v1326_v49 = vpop.f32.mrb[0].mxu1 }
 0x303   :  { %v2197_v2 = vadd.f32 %v1337_v4, %v1326_v49  ;;  %v1925_v32 = vpop.f32.mrb[1].mxu1 }
 0x305   :  { %1331 = vst.msk [vmem:[%s2812_s5] sm:$0xff] %vm1330_vm3, %v2197_v2 }

</bundles_post_ra>
